<compile_context>
chip_gen: v7x
topology: tpu7x:2x2x1
jax: 0.10.0
libtpu: 0.0.40
codegen_flags: <defaults>
</compile_context>

<pallas_src>
import jax
import jax.numpy as jnp
from jax.experimental import pallas as pl
from jax.experimental.pallas import tpu as pltpu

BN_EPS = 1e-5
LANE = 128
SUBLANE = 8
MAX_BATCH_TILE = 256


def _round_up(x, m):
    return (x + m - 1) // m * m


# ----------------------------------------------------------------------------- kernel
def _early_fusion_kernel(text_ref, image_ref,
                         w1t_ref, w1i_ref, b1_ref,
                         w2_ref, b2_ref,
                         w3_ref, b3_ref,
                         out_ref):
    # Fused "concat + Linear1" + ReLU  (Dropout = identity in eval mode).
    h = jnp.dot(text_ref[...], w1t_ref[...], preferred_element_type=jnp.float32)
    h += jnp.dot(image_ref[...], w1i_ref[...], preferred_element_type=jnp.float32)
    h = jnp.maximum(h + b1_ref[...], 0.0)

    # BN1 folded into W2/b2 offline -> Linear2 + ReLU.
    h = jnp.dot(h, w2_ref[...], preferred_element_type=jnp.float32) + b2_ref[...]
    h = jnp.maximum(h, 0.0)

    # BN2 folded into W3/b3 offline -> output Linear (fc2).
    out = jnp.dot(h, w3_ref[...], preferred_element_type=jnp.float32) + b3_ref[...]
    out_ref[...] = out.astype(out_ref.dtype)


# -------------------------------------------------------------- one-time parameter prep
def prepare_kernel_params(params, text_dim):
    """Fold BN into the following Linear, split W1, and lane-pad feature dims.

    Returns ((w1_text, w1_img, b1, w2', b2', w3', b3'), output_size).
    Intended to run once at model-load time, not per forward call.
    """
    (w1, b1, g1, be1, m1, v1,
     w2, b2, g2, be2, m2, v2,
     w3, b3) = params

    # Eval-mode BN is affine:
    #   BN(h) @ W + b == h @ (scale[:,None]*W) + ((beta - mean*scale) @ W + b)
    def fold(gamma, beta, mean, var, w_next, b_next):
        scale = gamma / jnp.sqrt(var + BN_EPS)          # (1, H)
        shift = beta - mean * scale                     # (1, H)
        return w_next * scale.reshape(-1, 1), b_next + shift @ w_next

    w2f, b2f = fold(g1, be1, m1, v1, w2, b2)
    w3f, b3f = fold(g2, be2, m2, v2, w3, b3)

    # Split the first Linear: cat(text, image) @ W1 becomes two whole-tile matmuls
    # inside the kernel (no in-kernel Ref slicing, no sublane-alignment assumption on Dt).
    w1t, w1i = w1[:text_dim, :], w1[text_dim:, :]

    out_size = w3f.shape[1]
    h1, h2 = w1.shape[1], w2f.shape[1]
    h1p, h2p, op = (_round_up(d, LANE) for d in (h1, h2, out_size))

    pad_cols = lambda a, n: jnp.pad(a, ((0, 0), (0, n - a.shape[1])))
    pad_rows = lambda a, n: jnp.pad(a, ((0, n - a.shape[0]), (0, 0)))

    w1t = pad_cols(w1t, h1p)
    w1i = pad_cols(w1i, h1p)
    b1p = pad_cols(b1, h1p)
    w2p = pad_cols(pad_rows(w2f, h1p), h2p)
    b2p = pad_cols(b2f, h2p)
    w3p = pad_cols(pad_rows(w3f, h2p), op)
    b3p = pad_cols(b3f, op)

    return (w1t, w1i, b1p, w2p, b2p, w3p, b3p), out_size


# --------------------------------------------------------------------------- entry point
def early_fusion_forward(text, image, kernel_params, out_size):
    """text: (B, Dt), image: (B, Di).  Returns (B, out_size) float32."""
    B, Dt = text.shape
    _, Di = image.shape
    w1t, w1i, b1, w2, b2, w3, b3 = kernel_params
    out_pad = w3.shape[1]

    # Batch tile: sublane-aligned, capped so activation tiles stay small enough for
    # double-buffering while minimizing per-grid-step overhead.  The batch grid axis
    # is "parallel" so it can be sharded across TensorCores (v7x megacore).
    tb = min(_round_up(B, SUBLANE), MAX_BATCH_TILE)
    b_pad = _round_up(B, tb)
    if b_pad != B:
        text = jnp.pad(text, ((0, b_pad - B), (0, 0)))
        image = jnp.pad(image, ((0, b_pad - B), (0, 0)))

    grid = (b_pad // tb,)
    act_spec = lambda d: pl.BlockSpec((tb, d), lambda i: (i, 0))
    const_spec = lambda a: pl.BlockSpec(a.shape, lambda i: (0, 0))

    out = pl.pallas_call(
        _early_fusion_kernel,
        out_shape=jax.ShapeDtypeStruct((b_pad, out_pad), jnp.float32),
        grid=grid,
        in_specs=[act_spec(Dt), act_spec(Di),
                  const_spec(w1t), const_spec(w1i), const_spec(b1),
                  const_spec(w2), const_spec(b2),
                  const_spec(w3), const_spec(b3)],
        out_specs=pl.BlockSpec((tb, out_pad), lambda i: (i, 0)),
        compiler_params=pltpu.CompilerParams(dimension_semantics=("parallel",)),
    )(text, image, w1t, w1i, b1, w2, b2, w3, b3)

    # Slice back to the logical shape only if padding was applied.
    if b_pad != B or out_pad != out_size:
        out = out[:B, :out_size]
    return out


# ------------------------------------------------------------------- synthetic params / ref
def make_params(key, text_dim, image_dim, hidden, output_size):
    """Deterministic synthetic parameters (shapes match the PyTorch module)."""
    dims = [text_dim + image_dim] + list(hidden)
    params = []
    for i in range(len(hidden)):
        d_in, d_out = dims[i], dims[i + 1]
        key, kw, kb, km, kv = jax.random.split(key, 5)
        w = jax.random.normal(kw, (d_in, d_out), jnp.float32) * (1.0 / jnp.sqrt(d_in))
        b = jax.random.normal(kb, (1, d_out), jnp.float32) * 0.01
        gamma = jnp.ones((1, d_out), jnp.float32)
        beta = jnp.zeros((1, d_out), jnp.float32)
        r_mean = jax.random.normal(km, (1, d_out), jnp.float32) * 0.01
        r_var = jnp.ones((1, d_out), jnp.float32) + 0.1 * jnp.abs(
            jax.random.normal(kv, (1, d_out), jnp.float32))
        params += [w, b, gamma, beta, r_mean, r_var]
    key, kw, kb = jax.random.split(key, 3)
    d_in = dims[-1]
    w3 = jax.random.normal(kw, (d_in, output_size), jnp.float32) * (1.0 / jnp.sqrt(d_in))
    b3 = jax.random.normal(kb, (1, output_size), jnp.float32) * 0.01
    params += [w3, b3]
    return tuple(params)


def reference_forward(text, image, params):
    (w1, b1, g1, be1, m1, v1,
     w2, b2, g2, be2, m2, v2,
     w3, b3) = params
    x = jnp.concatenate([text, image], axis=1)
    h = jnp.maximum(x @ w1 + b1, 0.0)
    h = (h - m1) * (g1 / jnp.sqrt(v1 + BN_EPS)) + be1
    h = jnp.maximum(h @ w2 + b2, 0.0)
    h = (h - m2) * (g2 / jnp.sqrt(v2 + BN_EPS)) + be2
    return h @ w3 + b3


if __name__ == "__main__":
    # Small shapes consistent with the module: hidden=[128, 64]
    B, TEXT_DIM, IMAGE_DIM, OUTPUT = 8, 32, 32, 8
    HIDDEN = [128, 64]

    key = jax.random.PRNGKey(0)
    k_text, k_image, k_params = jax.random.split(key, 3)
    text = jax.random.normal(k_text, (B, TEXT_DIM), jnp.float32)
    image = jax.random.normal(k_image, (B, IMAGE_DIM), jnp.float32)
    params = make_params(k_params, TEXT_DIM, IMAGE_DIM, HIDDEN, OUTPUT)

    # One-time parameter preparation (BN folding, W1 split, lane padding).
    kernel_params, out_size = prepare_kernel_params(params, TEXT_DIM)

    out = early_fusion_forward(text, image, kernel_params, out_size)
    out = jax.block_until_ready(out)

    ref = reference_forward(text, image, params)
    assert out.shape == (B, OUTPUT)
    assert jnp.allclose(out, ref, atol=1e-4, rtol=1e-4), "mismatch vs JAX reference"

    print("KERNEL_OK")
</pallas_src>

<mosaic_0001>
module attributes {stable_mosaic.version = 11 : i64} {
  func.func @_early_fusion_kernel(%arg0: i32, %arg1: memref<8x32xf32, #tpu.memory_space<vmem>>, %arg2: memref<8x32xf32, #tpu.memory_space<vmem>>, %arg3: memref<32x128xf32, #tpu.memory_space<vmem>>, %arg4: memref<32x128xf32, #tpu.memory_space<vmem>>, %arg5: memref<1x128xf32, #tpu.memory_space<vmem>>, %arg6: memref<128x128xf32, #tpu.memory_space<vmem>>, %arg7: memref<1x128xf32, #tpu.memory_space<vmem>>, %arg8: memref<128x128xf32, #tpu.memory_space<vmem>>, %arg9: memref<1x128xf32, #tpu.memory_space<vmem>>, %arg10: memref<8x128xf32, #tpu.memory_space<vmem>>) attributes {dimension_semantics = [#tpu.dimension_semantics<parallel>], iteration_bounds = array<i64: 1>, scalar_prefetch = 0 : i64, scratch_operands = 0 : i64, tpu.core_type = #tpu.core_type<tc>, window_params = [{transform_indices = @transform_0, window_bounds = array<i64: 8, 32>}, {transform_indices = @transform_1, window_bounds = array<i64: 8, 32>}, {pipeline_mode = #tpu.pipeline_mode<synchronous>, transform_indices = @transform_2, window_bounds = array<i64: 32, 128>}, {pipeline_mode = #tpu.pipeline_mode<synchronous>, transform_indices = @transform_3, window_bounds = array<i64: 32, 128>}, {pipeline_mode = #tpu.pipeline_mode<synchronous>, transform_indices = @transform_4, window_bounds = array<i64: 1, 128>}, {pipeline_mode = #tpu.pipeline_mode<synchronous>, transform_indices = @transform_5, window_bounds = array<i64: 128, 128>}, {pipeline_mode = #tpu.pipeline_mode<synchronous>, transform_indices = @transform_6, window_bounds = array<i64: 1, 128>}, {pipeline_mode = #tpu.pipeline_mode<synchronous>, transform_indices = @transform_7, window_bounds = array<i64: 128, 128>}, {pipeline_mode = #tpu.pipeline_mode<synchronous>, transform_indices = @transform_8, window_bounds = array<i64: 1, 128>}, {transform_indices = @transform_9, window_bounds = array<i64: 8, 128>}]} {
    %c0 = arith.constant 0 : index
    %c0_0 = arith.constant 0 : index
    %0 = vector.load %arg1[%c0, %c0_0] : memref<8x32xf32, #tpu.memory_space<vmem>>, vector<8x32xf32>
    %c0_1 = arith.constant 0 : index
    %c0_2 = arith.constant 0 : index
    %1 = vector.load %arg3[%c0_1, %c0_2] : memref<32x128xf32, #tpu.memory_space<vmem>>, vector<32x128xf32>
    %cst = arith.constant dense<0.000000e+00> : vector<8x128xf32>
    %2 = tpu.matmul %0, %1, %cst {dimension_numbers = #tpu.dot_dimension_numbers<[1], [0], [0], [1], [0, 0, 1, 1], [], []>} : vector<8x32xf32>, vector<32x128xf32>, vector<8x128xf32> -> vector<8x128xf32>
    %c0_3 = arith.constant 0 : index
    %c0_4 = arith.constant 0 : index
    %3 = vector.load %arg2[%c0_3, %c0_4] : memref<8x32xf32, #tpu.memory_space<vmem>>, vector<8x32xf32>
    %c0_5 = arith.constant 0 : index
    %c0_6 = arith.constant 0 : index
    %4 = vector.load %arg4[%c0_5, %c0_6] : memref<32x128xf32, #tpu.memory_space<vmem>>, vector<32x128xf32>
    %cst_7 = arith.constant dense<0.000000e+00> : vector<8x128xf32>
    %5 = tpu.matmul %3, %4, %cst_7 {dimension_numbers = #tpu.dot_dimension_numbers<[1], [0], [0], [1], [0, 0, 1, 1], [], []>} : vector<8x32xf32>, vector<32x128xf32>, vector<8x128xf32> -> vector<8x128xf32>
    %6 = arith.addf %2, %5 : vector<8x128xf32>
    %c0_8 = arith.constant 0 : index
    %c0_9 = arith.constant 0 : index
    %7 = vector.load %arg5[%c0_8, %c0_9] : memref<1x128xf32, #tpu.memory_space<vmem>>, vector<1x128xf32>
    %8 = vector.broadcast %7 : vector<1x128xf32> to vector<8x128xf32>
    %9 = arith.addf %6, %8 : vector<8x128xf32>
    %cst_10 = arith.constant 0.000000e+00 : f32
    %10 = vector.broadcast %cst_10 : f32 to vector<8x128xf32>
    %11 = arith.maximumf %9, %10 : vector<8x128xf32>
    %c0_11 = arith.constant 0 : index
    %c0_12 = arith.constant 0 : index
    %12 = vector.load %arg6[%c0_11, %c0_12] : memref<128x128xf32, #tpu.memory_space<vmem>>, vector<128x128xf32>
    %cst_13 = arith.constant dense<0.000000e+00> : vector<8x128xf32>
    %13 = tpu.matmul %11, %12, %cst_13 {dimension_numbers = #tpu.dot_dimension_numbers<[1], [0], [0], [1], [0, 0, 1, 1], [], []>} : vector<8x128xf32>, vector<128x128xf32>, vector<8x128xf32> -> vector<8x128xf32>
    %c0_14 = arith.constant 0 : index
    %c0_15 = arith.constant 0 : index
    %14 = vector.load %arg7[%c0_14, %c0_15] : memref<1x128xf32, #tpu.memory_space<vmem>>, vector<1x128xf32>
    %15 = vector.broadcast %14 : vector<1x128xf32> to vector<8x128xf32>
    %16 = arith.addf %13, %15 : vector<8x128xf32>
    %cst_16 = arith.constant 0.000000e+00 : f32
    %17 = vector.broadcast %cst_16 : f32 to vector<8x128xf32>
    %18 = arith.maximumf %16, %17 : vector<8x128xf32>
    %c0_17 = arith.constant 0 : index
    %c0_18 = arith.constant 0 : index
    %19 = vector.load %arg8[%c0_17, %c0_18] : memref<128x128xf32, #tpu.memory_space<vmem>>, vector<128x128xf32>
    %cst_19 = arith.constant dense<0.000000e+00> : vector<8x128xf32>
    %20 = tpu.matmul %18, %19, %cst_19 {dimension_numbers = #tpu.dot_dimension_numbers<[1], [0], [0], [1], [0, 0, 1, 1], [], []>} : vector<8x128xf32>, vector<128x128xf32>, vector<8x128xf32> -> vector<8x128xf32>
    %c0_20 = arith.constant 0 : index
    %c0_21 = arith.constant 0 : index
    %21 = vector.load %arg9[%c0_20, %c0_21] : memref<1x128xf32, #tpu.memory_space<vmem>>, vector<1x128xf32>
    %22 = vector.broadcast %21 : vector<1x128xf32> to vector<8x128xf32>
    %23 = arith.addf %20, %22 : vector<8x128xf32>
    %c0_22 = arith.constant 0 : index
    %c0_23 = arith.constant 0 : index
    %24 = vector.load %arg10[%c0_22, %c0_23] : memref<8x128xf32, #tpu.memory_space<vmem>>, vector<8x128xf32>
    tpu.vector_store %arg10[%c0_22, %c0_23], %23 {strides = array<i32>} : memref<8x128xf32, #tpu.memory_space<vmem>>, vector<8x128xf32>,
    return
  }
  func.func @transform_0(%arg0: i32) -> (i32, i32) {
    %c0_i32 = arith.constant 0 : i32
    %c0_i32_0 = arith.constant 0 : i32
    return %arg0, %c0_i32 : i32, i32
  }
  func.func @transform_1(%arg0: i32) -> (i32, i32) {
    %c0_i32 = arith.constant 0 : i32
    %c0_i32_0 = arith.constant 0 : i32
    return %arg0, %c0_i32 : i32, i32
  }
  func.func @transform_2(%arg0: i32) -> (i32, i32) {
    %c0_i32 = arith.constant 0 : i32
    %c0_i32_0 = arith.constant 0 : i32
    %c0_i32_1 = arith.constant 0 : i32
    return %c0_i32, %c0_i32_0 : i32, i32
  }
  func.func @transform_3(%arg0: i32) -> (i32, i32) {
    %c0_i32 = arith.constant 0 : i32
    %c0_i32_0 = arith.constant 0 : i32
    %c0_i32_1 = arith.constant 0 : i32
    return %c0_i32, %c0_i32_0 : i32, i32
  }
  func.func @transform_4(%arg0: i32) -> (i32, i32) {
    %c0_i32 = arith.constant 0 : i32
    %c0_i32_0 = arith.constant 0 : i32
    %c0_i32_1 = arith.constant 0 : i32
    return %c0_i32, %c0_i32_0 : i32, i32
  }
  func.func @transform_5(%arg0: i32) -> (i32, i32) {
    %c0_i32 = arith.constant 0 : i32
    %c0_i32_0 = arith.constant 0 : i32
    %c0_i32_1 = arith.constant 0 : i32
    return %c0_i32, %c0_i32_0 : i32, i32
  }
  func.func @transform_6(%arg0: i32) -> (i32, i32) {
    %c0_i32 = arith.constant 0 : i32
    %c0_i32_0 = arith.constant 0 : i32
    %c0_i32_1 = arith.constant 0 : i32
    return %c0_i32, %c0_i32_0 : i32, i32
  }
  func.func @transform_7(%arg0: i32) -> (i32, i32) {
    %c0_i32 = arith.constant 0 : i32
    %c0_i32_0 = arith.constant 0 : i32
    %c0_i32_1 = arith.constant 0 : i32
    return %c0_i32, %c0_i32_0 : i32, i32
  }
  func.func @transform_8(%arg0: i32) -> (i32, i32) {
    %c0_i32 = arith.constant 0 : i32
    %c0_i32_0 = arith.constant 0 : i32
    %c0_i32_1 = arith.constant 0 : i32
    return %c0_i32, %c0_i32_0 : i32, i32
  }
  func.func @transform_9(%arg0: i32) -> (i32, i32) {
    %c0_i32 = arith.constant 0 : i32
    %c0_i32_0 = arith.constant 0 : i32
    return %arg0, %c0_i32 : i32, i32
  }
}

</mosaic_0001>

<bundles_post_ra>
// kernel: tpu_custom_call.1
= control target key start
LH: loop header
LB: loop body
LE: loop exit
PB: predicated region body
PF: predicated region fallthrough
CT: control target
= control target key end

     0   :  { %14 = vsyncpa [#allocation3], 0  ;;  %s1051_s0 = inlined_call_operand.hbm [shape: f32[8,32], index: 0, kind: input, shape index: {}]   ;;  %s1052_s1 = inlined_call_operand.hbm [shape: f32[8,32], index: 1, kind: input, shape index: {}]   ;;  %s1053_s2 = inlined_call_operand.hbm [shape: f32[32,128], index: 2, kind: input, shape index: {}]   ;;  %s1054_s3 = inlined_call_operand.hbm [shape: f32[32,128], index: 3, kind: input, shape index: {}]   ;;  %s1055_s4 = inlined_call_operand.vmem [shape: f32[1,128], index: 4, kind: input, shape index: {}]   ;;  %s1056_s5 = inlined_call_operand.hbm [shape: f32[128,128], index: 5, kind: input, shape index: {}]   ;;  %s1057_s6 = inlined_call_operand.vmem [shape: f32[1,128], index: 6, kind: input, shape index: {}]   ;;  %s1058_s7 = inlined_call_operand.hbm [shape: f32[128,128], index: 7, kind: input, shape index: {}]   ;;  %s1059_s8 = inlined_call_operand.vmem [shape: f32[1,128], index: 8, kind: input, shape index: {}]   ;;  %s1060_s9 = inlined_call_operand.hbm [shape: f32[8,128], index: 9, kind: output, shape index: {}]  }
   0x1   :  { %15 = vsyncpa [#allocation6], 0 }
   0x2   :  { %16 = vsyncpa [#allocation9], 0 }
   0x3   :  { %17 = vsyncpa [#allocation12], 0 }
   0x4   :  { %18 = vsyncpa [#allocation4], 0  ;;  %s860_s30 = smov [#allocation5]   ;;  %s696_s13 = scalar_lea.hbm %s1052_s1, 128 }
   0x5   :  { %s35_s10 = sshll.u32 %s860_s30, 4  ;;  %p697_p0 = scmp.ne.s32.totalorder %s1052_s1, %s696_s13  ;;  %s36_s10 = int_to_ptr.vmem [resolvable:$true] %s35_s10 }
   0x6   :  { %p700_p1 = scmp.lt.u32.totalorder %s696_s13, %s1052_s1 }
   0x8   :  { %p702_p2 = pnand %p700_p1, %p697_p0 }
   0xa   :  { %705 = shalt.err (!%p702_p2)
}
   0xb   :  { %s706_s18 = scalar_lea.vmem %s36_s10, 128  ;;  %p711_p4 = scmp.lt.s32.totalorder %s36_s10, %s36_s10 }
   0xc   :  { %p707_p3 = scmp.ne.s32.totalorder %s36_s10, %s706_s18  ;;  %p712_p5 = scmp.lt.s32.totalorder %s706_s18, %s706_s18 }
   0xe   :  { %p713_p6 = por %p712_p5, %p711_p4 }
  0x10   :  { %p714_p7 = pnand %p713_p6, %p707_p3 }
  0x12   :  { %717 = shalt.err (!%p714_p7)
}
  0x13   :  { %38 = dma.hbm_to_vmem [thread:$0]  %s1052_s1, 128, %s36_s10, [#allocation6]  }
  0x14   :  { %s861_s21 = smov [#allocation8]   ;;  %s862_s23 = smov [#allocation2]  }
  0x15   :  { %s56_s22 = sshll.u32 %s861_s21, 4  ;;  %s25_s24 = sshll.u32 %s862_s23, 4  ;;  %s57_s22 = int_to_ptr.vmem [resolvable:$true] %s56_s22  ;;  %s26_s24 = int_to_ptr.vmem [resolvable:$true] %s25_s24 }
  0x16   :  { %s718_s27 = scalar_lea.hbm %s1054_s3, 512 }
  0x17   :  { %p719_p8 = scmp.ne.s32.totalorder %s1054_s3, %s718_s27  ;;  %p722_p9 = scmp.lt.u32.totalorder %s718_s27, %s1054_s3 }
  0x19   :  { %p724_p10 = pnand %p722_p9, %p719_p8 }
  0x1b   :  { %727 = shalt.err (!%p724_p10)
}
  0x1c   :  { %s728_s1 = scalar_lea.vmem %s57_s22, 512  ;;  %p733_p12 = scmp.lt.s32.totalorder %s57_s22, %s57_s22 }
  0x1d   :  { %p729_p11 = scmp.ne.s32.totalorder %s57_s22, %s728_s1  ;;  %p734_p13 = scmp.lt.s32.totalorder %s728_s1, %s728_s1 }
  0x1f   :  { %p735_p0 = por %p734_p13, %p733_p12 }
  0x21   :  { %p736_p1 = pnand %p735_p0, %p729_p11 }
  0x23   :  { %739 = shalt.err (!%p736_p1)
}
  0x24   :  { %s863_s10 = smov 128   ;;  %s864_s12 = smov 8  }
  0x25   :  { %62 = dma.hbm_to_vmem [thread:$0]  %s1054_s3, 512, %s57_s22, [#allocation9], %s863_s10, %s863_s10, %s864_s12  }
  0x26   :  { %s740_s17 = scalar_lea.hbm %s1051_s0, 128 }
  0x27   :  { %p741_p2 = scmp.ne.s32.totalorder %s1051_s0, %s740_s17  ;;  %p744_p3 = scmp.lt.u32.totalorder %s740_s17, %s1051_s0 }
  0x29   :  { %p746_p4 = pnand %p744_p3, %p741_p2 }
  0x2b   :  { %749 = shalt.err (!%p746_p4)
}
  0x2c   :  { %s750_s23 = scalar_lea.vmem %s26_s24, 128  ;;  %p755_p6 = scmp.lt.s32.totalorder %s26_s24, %s26_s24 }
  0x2d   :  { %p751_p5 = scmp.ne.s32.totalorder %s26_s24, %s750_s23  ;;  %p756_p7 = scmp.lt.s32.totalorder %s750_s23, %s750_s23 }
  0x2f   :  { %p757_p8 = por %p756_p7, %p755_p6 }
  0x31   :  { %p758_p9 = pnand %p757_p8, %p751_p5 }
  0x33   :  { %761 = shalt.err (!%p758_p9)
}
  0x34   :  { %28 = dma.hbm_to_vmem [thread:$0]  %s1051_s0, 128, %s26_s24, [#allocation3]  }
  0x35   :  { %s865_s25 = smov [#allocation7]   ;;  %s866_s27 = smov [#allocation10]  }
  0x36   :  { %s44_s26 = sshll.u32 %s865_s25, 4  ;;  %s70_s28 = sshll.u32 %s866_s27, 4  ;;  %s45_s26 = int_to_ptr.vmem [resolvable:$true] %s44_s26  ;;  %s71_s28 = int_to_ptr.vmem [resolvable:$true] %s70_s28 }
  0x37   :  { %s762_s11 = scalar_lea.hbm %s1053_s2, 512 }
  0x38   :  { %p763_p10 = scmp.ne.s32.totalorder %s1053_s2, %s762_s11  ;;  %p766_p11 = scmp.lt.u32.totalorder %s762_s11, %s1053_s2 }
  0x3a   :  { %p768_p12 = pnand %p766_p11, %p763_p10 }
  0x3c   :  { %771 = shalt.err (!%p768_p12)
}
  0x3d   :  { %s772_s0 = scalar_lea.vmem %s45_s26, 512  ;;  %p777_p0 = scmp.lt.s32.totalorder %s45_s26, %s45_s26 }
  0x3e   :  { %p773_p13 = scmp.ne.s32.totalorder %s45_s26, %s772_s0  ;;  %p778_p1 = scmp.lt.s32.totalorder %s772_s0, %s772_s0 }
  0x40   :  { %p779_p2 = por %p778_p1, %p777_p0 }
  0x42   :  { %p780_p3 = pnand %p779_p2, %p773_p13 }
  0x44   :  { %783 = shalt.err (!%p780_p3)
}
  0x45   :  { %50 = dma.hbm_to_vmem [thread:$0]  %s1053_s2, 512, %s45_s26, [#allocation6], %s863_s10, %s863_s10, %s864_s12  }
  0x46   :  { %s784_s19 = scalar_lea.hbm %s1056_s5, 2048 }
  0x47   :  { %p785_p4 = scmp.ne.s32.totalorder %s1056_s5, %s784_s19  ;;  %p788_p5 = scmp.lt.u32.totalorder %s784_s19, %s1056_s5 }
  0x49   :  { %p790_p6 = pnand %p788_p5, %p785_p4 }
  0x4b   :  { %793 = shalt.err (!%p790_p6)
}
  0x4c   :  { %s794_s22 = scalar_lea.vmem %s71_s28, 2048  ;;  %p799_p8 = scmp.lt.s32.totalorder %s71_s28, %s71_s28 }
  0x4d   :  { %p795_p7 = scmp.ne.s32.totalorder %s71_s28, %s794_s22  ;;  %p800_p9 = scmp.lt.s32.totalorder %s794_s22, %s794_s22 }
  0x4f   :  { %p801_p10 = por %p800_p9, %p799_p8 }
  0x51   :  { %p802_p11 = pnand %p801_p10, %p795_p7 }
  0x53   :  { %805 = shalt.err (!%p802_p11)
}
  0x54   :  { %76 = dma.hbm_to_vmem [thread:$0]  %s1056_s5, 2048, %s71_s28, [#allocation9], %s863_s10, %s863_s10, %s864_s12  }
  0x55   :  { %s867_s26 = smov [#allocation11]   ;;  %s806_s11 = scalar_lea.hbm %s1058_s7, 2048 }
  0x56   :  { %s84_s27 = sshll.u32 %s867_s26, 4  ;;  %p807_p12 = scmp.ne.s32.totalorder %s1058_s7, %s806_s11  ;;  %s85_s27 = int_to_ptr.vmem [resolvable:$true] %s84_s27 }
  0x57   :  { %p810_p13 = scmp.lt.u32.totalorder %s806_s11, %s1058_s7 }
  0x59   :  { %p812_p0 = pnand %p810_p13, %p807_p12 }
  0x5b   :  { %815 = shalt.err (!%p812_p0)
}
  0x5c   :  { %s816_s0 = scalar_lea.vmem %s85_s27, 2048  ;;  %p821_p2 = scmp.lt.s32.totalorder %s85_s27, %s85_s27 }
  0x5d   :  { %p817_p1 = scmp.ne.s32.totalorder %s85_s27, %s816_s0  ;;  %p822_p3 = scmp.lt.s32.totalorder %s816_s0, %s816_s0 }
  0x5f   :  { %p823_p4 = por %p822_p3, %p821_p2 }
  0x61   :  { %p824_p5 = pnand %p823_p4, %p817_p1 }
  0x63   :  { %827 = shalt.err (!%p824_p5)
}
  0x64   :  { %90 = dma.hbm_to_vmem [thread:$0]  %s1058_s7, 2048, %s85_s27, [#allocation12], %s863_s10, %s863_s10, %s864_s12  }
  0x65   :  { %850 = dma.done.wait [#allocation3], 128  }
  0x66   :  { %851 = vsyncadd [#allocation3], 4294967168 }
  0x67   :  { %852 = dma.done.wait [#allocation6], 640  }
  0x68   :  { %853 = vsyncadd [#allocation6], 4294966656 }
  0x69   :  { %854 = dma.done.wait [#allocation9], 2560  }
  0x6a   :  { %855 = vsyncadd [#allocation9], 4294964736 }
  0x6b   :  { %856 = dma.done.wait [#allocation12], 2048  }
  0x6c   :  { %857 = vsyncadd [#allocation12], 4294965248  ;;  %v868_v0 = vmov 0.0|0.0   ;;  %vm869_vm0 = vmmov 0   ;;  %v870_v1 = vmov 0.0   ;;  %v117_v2 = vld [vmem:[#allocation8] sm:$0xff] }
  0x6d   :  { %624 = vmatprep.subr.bf16.mxu0 %v868_v0  ;;  %630 = vmatprep.subr.bf16.mxu1 %v868_v0  ;;  %v118_v3 = vld [vmem:[#allocation8 + $0x8] sm:$0xff]  ;;  %v112_v4 = vld [vmem:[#allocation7] sm:$0xff]  ;;  %v119_v7 = vld [vmem:[#allocation8 + $0x10] sm:$0xff]  ;;  %vm121_vm1 = vcmask 261120   ;;  %s871_s17 = smov [#allocation13]  }
  0x6e   :  { %540 = vmatprep.mubr.msk.f32.mxu0 %vm869_vm0, %v870_v1  ;;  %551 = vmatprep.mubr.msk.f32.mxu1 %vm869_vm0, %v870_v1  ;;  %v625_v5 = vpack.c.bf16 %v118_v3, %v117_v2  ;;  %v113_v6 = vld [vmem:[#allocation7 + $0x8] sm:$0xff]  ;;  %v120_v8 = vld [vmem:[#allocation8 + $0x18] sm:$0xff]  ;;  %v114_v10 = vld [vmem:[#allocation7 + $0x10] sm:$0xff]  ;;  %s471_s18 = sshll.u32 %s871_s17, 4  ;;  %s472_s18 = int_to_ptr.vmem [resolvable:$true] %s471_s18 }
  0x6f   :  { %v631_v9 = vpack.c.bf16 %v113_v6, %v112_v4  ;;  %v115_v11 = vld [vmem:[#allocation7 + $0x18] sm:$0xff]  ;;  %v628_v12 = vpack.c.bf16 %v120_v8, %v119_v7  ;;  %v277_v14 = vld [vmem:[#allocation10] sm:$0xff]  ;;  %v278_v15 = vld [vmem:[#allocation10 + $0x8] sm:$0xff]  ;;  %s828_s19 = scalar_lea.vmem %s472_s18, 128  ;;  %p833_p7 = scmp.lt.s32.totalorder %s472_s18, %s472_s18 }
  0x70   :  { %626 = vmatpush3.bf16.msra.mxu0 %v625_v5  ;;  %v634_v13 = vpack.c.bf16 %v115_v11, %v114_v10  ;;  %v116_v16 = vld [vmem:[#allocation5] sm:$0xff]  ;;  %v637_v17 = vpack.c.bf16 %v278_v15, %v277_v14  ;;  %v111_v18 = vld [vmem:[#allocation2] sm:$0xff]  ;;  %v281_v22 = vld [vmem:[#allocation10 + $0x20] sm:$0xff]  ;;  %p829_p6 = scmp.ne.s32.totalorder %s472_s18, %s828_s19  ;;  %p834_p8 = scmp.lt.s32.totalorder %s828_s19, %s828_s19 }
  0x71   :  { %632 = vmatpush3.bf16.msra.mxu1 %v631_v9  ;;  %627 = vmatprep.subr.bf16.mxu0 %v868_v0  ;;  %v279_v19 = vld [vmem:[#allocation10 + $0x10] sm:$0xff]  ;;  %v280_v20 = vld [vmem:[#allocation10 + $0x18] sm:$0xff]  ;;  %v282_v23 = vld [vmem:[#allocation10 + $0x28] sm:$0xff] }
  0x72   :  { %633 = vmatprep.subr.bf16.mxu1 %v868_v0  ;;  %v640_v21 = vpack.c.bf16 %v280_v20, %v279_v19  ;;  %v643_v24 = vpack.c.bf16 %v282_v23, %v281_v22  ;;  %v283_v25 = vld [vmem:[#allocation10 + $0x30] sm:$0xff]  ;;  %v284_v26 = vld [vmem:[#allocation10 + $0x38] sm:$0xff]  ;;  %v285_v28 = vld [vmem:[#allocation10 + $0x40] sm:$0xff]  ;;  %p835_p9 = por %p834_p8, %p833_p7 }
  0x73   :  { %v646_v27 = vpack.c.bf16 %v284_v26, %v283_v25  ;;  %v286_v29 = vld [vmem:[#allocation10 + $0x48] sm:$0xff]  ;;  %v287_v31 = vld [vmem:[#allocation10 + $0x50] sm:$0xff]  ;;  %v288_v32 = vld [vmem:[#allocation10 + $0x58] sm:$0xff] }
  0x74   :  { %629 = vmatpush3.bf16.msra.mxu0 %v628_v12  ;;  %v649_v30 = vpack.c.bf16 %v286_v29, %v285_v28  ;;  %v652_v33 = vpack.c.bf16 %v288_v32, %v287_v31  ;;  %v289_v34 = vld [vmem:[#allocation10 + $0x60] sm:$0xff]  ;;  %v290_v35 = vld [vmem:[#allocation10 + $0x68] sm:$0xff]  ;;  %v291_v37 = vld [vmem:[#allocation10 + $0x70] sm:$0xff]  ;;  %p836_p10 = pnand %p835_p9, %p829_p6 }
  0x75   :  { %635 = vmatpush3.bf16.msra.mxu1 %v634_v13  ;;  %636 = vmatprep.subr.bf16.mxu0 %v868_v0  ;;  %v655_v36 = vpack.c.bf16 %v290_v35, %v289_v34  ;;  %v292_v38 = vld [vmem:[#allocation10 + $0x78] sm:$0xff]  ;;  %v371_v40 = vld [vmem:[#allocation11] sm:$0xff]  ;;  %v372_v41 = vld [vmem:[#allocation11 + $0x8] sm:$0xff] }
  0x76   :  { %660 = vmatprep.subr.bf16.mxu1 %v868_v0  ;;  %v658_v39 = vpack.c.bf16 %v292_v38, %v291_v37  ;;  %v373_v42 = vld [vmem:[#allocation11 + $0x10] sm:$0xff]  ;;  %v661_v43 = vpack.c.bf16 %v372_v41, %v371_v40  ;;  %v374_v44 = vld [vmem:[#allocation11 + $0x18] sm:$0xff]  ;;  %v375_v46 = vld [vmem:[#allocation11 + $0x20] sm:$0xff] }
  0x77   :  { %541 = vmatmul.mubr.msk.f32.vlgmr.msra.gmra.mrb[0].mxu0 %vm121_vm1, %v116_v16  ;;  %v664_v45 = vpack.c.bf16 %v374_v44, %v373_v42  ;;  %v376_v47 = vld [vmem:[#allocation11 + $0x28] sm:$0xff]  ;;  %v377_v49 = vld [vmem:[#allocation11 + $0x30] sm:$0xff]  ;;  %v378_v50 = vld [vmem:[#allocation11 + $0x38] sm:$0xff] }
  0x78   :  { %552 = vmatmul.mubr.msk.f32.vlgmr.msra.gmra.mrb[0].mxu1 %vm121_vm1, %v111_v18  ;;  %638 = vmatpush3.bf16.msra.mxu0 %v637_v17  ;;  %v667_v48 = vpack.c.bf16 %v376_v47, %v375_v46  ;;  %v670_v51 = vpack.c.bf16 %v378_v50, %v377_v49  ;;  %v379_v52 = vld [vmem:[#allocation11 + $0x40] sm:$0xff]  ;;  %v380_v53 = vld [vmem:[#allocation11 + $0x48] sm:$0xff]  ;;  %v381_v55 = vld [vmem:[#allocation11 + $0x50] sm:$0xff] }
  0x79   :  { %639 = vmatprep.subr.bf16.mxu0 %v868_v0  ;;  %586 = vmatprep.mubr.msk.f32.mxu0 %vm869_vm0, %v870_v1  ;;  %v673_v54 = vpack.c.bf16 %v380_v53, %v379_v52  ;;  %v382_v56 = vld [vmem:[#allocation11 + $0x58] sm:$0xff]  ;;  %v383_v58 = vld [vmem:[#allocation11 + $0x60] sm:$0xff]  ;;  %v384_v59 = vld [vmem:[#allocation11 + $0x68] sm:$0xff] }
  0x7a   :  { %621 = vmatprep.mubr.msk.f32.mxu1 %vm869_vm0, %v870_v1  ;;  %662 = vmatpush3.bf16.msra.mxu1 %v661_v43  ;;  %v676_v57 = vpack.c.bf16 %v382_v56, %v381_v55  ;;  %v679_v60 = vpack.c.bf16 %v384_v59, %v383_v58  ;;  %v485_v63 = vld [vmem:[%s1055_s4] ss:$0 sm:$0xff]  ;;  %v386_v7 = vld [vmem:[#allocation11 + $0x78] sm:$0xff] }
  0x7b   :  { %663 = vmatprep.subr.bf16.mxu1 %v868_v0  ;;  %v385_v6 = vld [vmem:[#allocation11 + $0x70] sm:$0xff] }
  0x7c   :  { %641 = vmatpush3.bf16.msra.mxu0 %v640_v21  ;;  %v682_v8 = vpack.c.bf16 %v386_v7, %v385_v6  ;;  %v487_v13 = vld [vmem:[%s1059_s8] ss:$0 sm:$0xff] }
  0x7d   :  { %642 = vmatprep.subr.bf16.mxu0 %v868_v0 }
  0x7e   :  { %665 = vmatpush3.bf16.msra.mxu1 %v664_v45 }
  0x7f   :  { %666 = vmatprep.subr.bf16.mxu1 %v868_v0 }
  0x80   :  { %644 = vmatpush3.bf16.msra.mxu0 %v643_v24 }
  0x81   :  { %645 = vmatprep.subr.bf16.mxu0 %v868_v0 }
  0x82   :  { %668 = vmatpush3.bf16.msra.mxu1 %v667_v48 }
  0x83   :  { %669 = vmatprep.subr.bf16.mxu1 %v868_v0 }
  0x84   :  { %647 = vmatpush3.bf16.msra.mxu0 %v646_v27 }
  0x85   :  { %648 = vmatprep.subr.bf16.mxu0 %v868_v0 }
  0x86   :  { %671 = vmatpush3.bf16.msra.mxu1 %v670_v51 }
  0x87   :  { %672 = vmatprep.subr.bf16.mxu1 %v868_v0 }
  0x88   :  { %650 = vmatpush3.bf16.msra.mxu0 %v649_v30 }
  0x89   :  { %651 = vmatprep.subr.bf16.mxu0 %v868_v0 }
  0x8a   :  { %674 = vmatpush3.bf16.msra.mxu1 %v673_v54 }
  0x8b   :  { %675 = vmatprep.subr.bf16.mxu1 %v868_v0 }
  0x8c   :  { %653 = vmatpush3.bf16.msra.mxu0 %v652_v33 }
  0x8d   :  { %654 = vmatprep.subr.bf16.mxu0 %v868_v0 }
  0x8e   :  { %677 = vmatpush3.bf16.msra.mxu1 %v676_v57 }
  0x8f   :  { %678 = vmatprep.subr.bf16.mxu1 %v868_v0 }
  0x90   :  { %656 = vmatpush3.bf16.msra.mxu0 %v655_v36 }
  0x91   :  { %657 = vmatprep.subr.bf16.mxu0 %v868_v0 }
  0x92   :  { %680 = vmatpush3.bf16.msra.mxu1 %v679_v60 }
  0x93   :  { %681 = vmatprep.subr.bf16.mxu1 %v868_v0  ;;  %v486_v0 = vld [vmem:[%s1057_s6] ss:$0 sm:$0xff] }
  0x94   :  { %659 = vmatpush3.bf16.msra.mxu0 %v658_v39 }
  0x96   :  { %683 = vmatpush3.bf16.msra.mxu1 %v682_v8 }
 0x14a   :  { %v191_v61 = vpop.f32.mrb[0].mxu0 }
 0x14b   :  { %v264_v62 = vpop.f32.mrb[0].mxu1  ;;  %v542_v1 = vpop.f32.mrb[1].mxu0 }
 0x14c   :  { %v265_v2 = vadd.f32 %v264_v62, %v191_v61  ;;  %v553_v3 = vpop.f32.mrb[1].mxu1 }
 0x14e   :  { %v275_v4 = vadd.f32 %v485_v63, %v265_v2 }
 0x150   :  { %v276_v5 = vmax.f32 %v275_v4, 0.0 }
 0x152   :  { %587 = vmatmul.mubr.f32.vlgmr.msra.gmra.mrb[2].mxu0 %v276_v5 }
 0x225   :  { %v366_v9 = vpop.f32.mrb[2].mxu0 }
 0x226   :  { %v367_v10 = vadd.f32 %v486_v0, %v366_v9  ;;  %v588_v11 = vpop.f32.mrb[3].mxu0 }
 0x228   :  { %v370_v12 = vmax.f32 %v367_v10, 0.0 }
 0x22a   :  { %622 = vmatmul.mubr.f32.vlgmr.msra.gmra.mrb[2].mxu1 %v370_v12 }
 0x2fd   :  { %v460_v14 = vpop.f32.mrb[2].mxu1 }
 0x2fe   :  { %v461_v15 = vadd.f32 %v487_v13, %v460_v14  ;;  %v623_v16 = vpop.f32.mrb[3].mxu1 }
 0x300   :  { %464 = vst [vmem:[#allocation13] sm:$0xff] %v461_v15 }
 0x301   :  { %839 = shalt.err (!%p836_p10)
}
 0x302   :  { %s840_s21 = scalar_lea.hbm %s1060_s9, 128 }
 0x303   :  { %p841_p11 = scmp.ne.s32.totalorder %s1060_s9, %s840_s21  ;;  %p844_p12 = scmp.lt.u32.totalorder %s840_s21, %s1060_s9 }
 0x305   :  { %p846_p13 = pnand %p844_p12, %p841_p11 }
 0x307   :  { %849 = shalt.err (!%p846_p13)
}
 0x308   :  { %474 = dma.vmem_to_hbm [thread:$0]  %s472_s18, 128, %s1060_s9, [#allocation4]  }
 0x309   :  { %858 = dma.done.wait [#allocation4], 128  }
 0x30a   :  { %859 = vsyncadd [#allocation4], 4294967168 }
 0x30b   :  { %478 = vsyncpa [#allocation3], 1 }
 0x30c   :  { %479 = vsyncpa [#allocation6], 1 }
 0x30d   :  { %480 = vsyncpa [#allocation9], 1 }
 0x30e   :  { %481 = vsyncpa [#allocation12], 1 }
 0x30f   :  { %482 = vsyncpa [#allocation4], 1 }

</bundles_post_ra>
